<compile_context>
chip_gen: v6e
topology: v6e:2x2x1
jax: 0.10.0
libtpu: 0.0.40
codegen_flags: <defaults>
</compile_context>

<pallas_src>
import functools

import jax
import jax.numpy as jnp
from jax.experimental import pallas as pl
from jax.experimental.pallas import tpu as pltpu


def _attention_kernel(x_q_ref, x_kv_ref, w_q_ref, b_q_ref, w_kv_ref, b_kv_ref,
                      w_fc_ref, b_fc_ref, out_ref,
                      q_scr, m_scr, l_scr, acc_scr, *,
                      num_heads, hidden_size, d_model, d_pad):
    H, hd, D, Dp = num_heads, hidden_size, d_model, d_pad
    tq = x_q_ref.shape[0]
    tk = x_kv_ref.shape[0]
    j = pl.program_id(1)
    nk = pl.num_programs(1)

    # ---- once per query block: Q projection (scale folded into weights) ------
    @pl.when(j == 0)
    def _init():
        x_q = x_q_ref[...].astype(jnp.bfloat16)                      # (tq, Dp)
        q = jnp.dot(x_q, w_q_ref[...],
                    preferred_element_type=jnp.float32) + b_q_ref[...]   # (tq, D) f32
        q_bf = q.astype(jnp.bfloat16)
        # split heads via lane slices + stack (no lane-splitting reshape)
        q_scr[...] = jnp.stack([q_bf[:, h * hd:(h + 1) * hd] for h in range(H)],
                               axis=0)                               # (H, tq, hd) bf16
        m_scr[...] = jnp.full_like(m_scr, -jnp.inf)
        l_scr[...] = jnp.zeros_like(l_scr)
        acc_scr[...] = jnp.zeros_like(acc_scr)

    # ---- every step: K/V projection for this kv tile (one matmul for both) ---
    x_kv = x_kv_ref[...].astype(jnp.bfloat16)                        # (tk, Dp)
    kv = jnp.dot(x_kv, w_kv_ref[...],
                 preferred_element_type=jnp.float32) + b_kv_ref[...]     # (tk, 2D) f32
    kv_bf = kv.astype(jnp.bfloat16)                                  # single cast for K and V
    k = jnp.stack([kv_bf[:, h * hd:(h + 1) * hd] for h in range(H)], axis=0)       # (H, tk, hd)
    v = jnp.stack([kv_bf[:, D + h * hd:D + (h + 1) * hd] for h in range(H)], axis=0)

    # ---- online softmax over kv tiles ----------------------------------------
    s = jnp.einsum('hqd,hkd->hqk', q_scr[...], k,
                   preferred_element_type=jnp.float32)               # (H, tq, tk) f32
    m_prev = m_scr[...]
    m_new = jnp.maximum(m_prev, jnp.max(s, axis=-1, keepdims=True))
    alpha = jnp.exp(m_prev - m_new)
    p = jnp.exp(s - m_new)
    l_scr[...] = alpha * l_scr[...] + jnp.sum(p, axis=-1, keepdims=True)
    acc_scr[...] = alpha * acc_scr[...] + jnp.einsum(
        'hqk,hkd->hqd', p.astype(jnp.bfloat16), v,
        preferred_element_type=jnp.float32)                          # (H, tq, hd) f32
    m_scr[...] = m_new

    # ---- once per query block: normalize, FC, residual, LayerNorm ------------
    @pl.when(j == nk - 1)
    def _finalize():
        attn = acc_scr[...] * pl.reciprocal(l_scr[...], approx=True)     # (H, tq, hd) f32
        # merge heads along lanes once -> single (tq, D) x (D, Dp) FC matmul
        attn_m = jnp.concatenate([attn[h] for h in range(H)],
                                 axis=-1).astype(jnp.bfloat16)           # (tq, D) bf16
        fc = jnp.dot(attn_m, w_fc_ref[...],
                     preferred_element_type=jnp.float32) + b_fc_ref[...]  # (tq, Dp) f32
        y = fc + x_q_ref[...]                                            # residual (pad lanes stay 0)

        inv_d = jnp.float32(1.0 / D)
        if Dp == D:                                                      # lane-aligned D: no mask
            mu = jnp.sum(y, axis=-1, keepdims=True) * inv_d
            diff = y - mu
        else:
            lane = jax.lax.broadcasted_iota(jnp.int32, (tq, Dp), 1)
            valid = lane < D
            mu = jnp.sum(y, axis=-1, keepdims=True) * inv_d              # pad lanes contribute 0
            diff = jnp.where(valid, y - mu, jnp.float32(0.0))
        var = jnp.sum(diff * diff, axis=-1, keepdims=True) * inv_d
        out_ref[...] = (diff * jax.lax.rsqrt(var + jnp.float32(1e-5))).astype(out_ref.dtype)


def _pick_tile(n, cap):
    if n <= cap:
        return n
    for t in range(cap, 7, -8):
        if n % t == 0:
            return t
    return n


def attention_forward(src, wq, bq, wk, bk, wv, bv, wfc, bfc, *,
                      num_heads, hidden_size):
    B, S, D = src.shape
    H, hd = num_heads, hidden_size
    assert D == H * hd
    N = B * S
    LANE = 128
    Dp = ((D + LANE - 1) // LANE) * LANE
    pad_w = Dp - D

    f32, bf16 = jnp.float32, jnp.bfloat16

    # Flatten tokens (torch attends over the flattened B*S axis); pad lanes only if needed.
    x = src.reshape(N, D).astype(f32)
    if pad_w:
        x = jnp.pad(x, ((0, 0), (0, pad_w)))

    # torch Linear stores W as (out, in): y = x @ W.T + b.
    # Fold the 1/hidden_size score scale into the Q weights and bias (free, done once).
    inv_hd = 1.0 / float(hd)
    w_q = (wq.T * inv_hd).astype(f32)
    b_q = (bq * inv_hd).reshape(1, D).astype(f32)
    w_kv = jnp.concatenate([wk.T, wv.T], axis=1).astype(f32)                 # (D, 2D)
    b_kv = jnp.concatenate([bk, bv]).reshape(1, 2 * D).astype(f32)
    w_fc = wfc.T.astype(f32)                                                  # (D, D)
    b_fc = bfc.reshape(1, D).astype(f32)
    if pad_w:
        w_q = jnp.pad(w_q, ((0, pad_w), (0, 0)))
        w_kv = jnp.pad(w_kv, ((0, pad_w), (0, 0)))
        w_fc = jnp.pad(w_fc, ((0, 0), (0, pad_w)))
        b_fc = jnp.pad(b_fc, ((0, 0), (0, pad_w)))
    w_q = w_q.astype(bf16)       # (Dp, D)   bf16 MXU operand
    w_kv = w_kv.astype(bf16)     # (Dp, 2D)
    w_fc = w_fc.astype(bf16)     # (D, Dp)

    # Tile the flattened token axis for q and kv; weights stay resident.
    tq = _pick_tile(N, 256)
    tk = _pick_tile(N, 256)
    nq, nk = N // tq, N // tk

    kern = functools.partial(_attention_kernel, num_heads=H, hidden_size=hd,
                             d_model=D, d_pad=Dp)

    out_p = pl.pallas_call(
        kern,
        out_shape=jax.ShapeDtypeStruct((N, Dp), f32),
        grid=(nq, nk),
        in_specs=[
            pl.BlockSpec((tq, Dp), lambda i, j: (i, 0)),       # x rows for this query block
            pl.BlockSpec((tk, Dp), lambda i, j: (j, 0)),       # x rows for this kv block
            pl.BlockSpec((Dp, D), lambda i, j: (0, 0)),        # W_q  (resident)
            pl.BlockSpec((1, D), lambda i, j: (0, 0)),         # b_q
            pl.BlockSpec((Dp, 2 * D), lambda i, j: (0, 0)),    # W_kv (resident)
            pl.BlockSpec((1, 2 * D), lambda i, j: (0, 0)),     # b_kv
            pl.BlockSpec((D, Dp), lambda i, j: (0, 0)),        # W_fc (resident)
            pl.BlockSpec((1, Dp), lambda i, j: (0, 0)),        # b_fc
        ],
        out_specs=pl.BlockSpec((tq, Dp), lambda i, j: (i, 0)),
        scratch_shapes=[
            pltpu.VMEM((H, tq, hd), bf16),   # per-head Q (bf16 MXU operand)
            pltpu.VMEM((H, tq, 1), f32),     # running max
            pltpu.VMEM((H, tq, 1), f32),     # running sum
            pltpu.VMEM((H, tq, hd), f32),    # output accumulator
        ],
        compiler_params=pltpu.CompilerParams(
            dimension_semantics=("parallel", "arbitrary"),
            vmem_limit_bytes=48 * 1024 * 1024),
    )(x, x, w_q, b_q, w_kv, b_kv, w_fc, b_fc)

    out = out_p[:, :D] if pad_w else out_p
    return out.reshape(B, S, D).astype(src.dtype)


def attention_reference(src, wq, bq, wk, bk, wv, bv, wfc, bfc, *,
                        num_heads, hidden_size):
    """Pure-jnp f32 reference reproducing the torch forward semantics exactly."""
    B, S, D = src.shape
    x2 = src.reshape(B * S, D)
    q = (x2 @ wq.T + bq).reshape(B * S, num_heads, hidden_size).transpose(1, 0, 2)
    k = (x2 @ wk.T + bk).reshape(B * S, num_heads, hidden_size).transpose(1, 2, 0)
    v = (x2 @ wv.T + bv).reshape(B * S, num_heads, hidden_size).transpose(1, 0, 2)
    scores = jnp.matmul(q, k) / float(hidden_size)       # (H, B*S, B*S): batch-mixed attention
    probs = jax.nn.softmax(scores, axis=2)
    attn = jnp.matmul(probs, v)                          # (H, B*S, hd)
    attn = attn.transpose(1, 0, 2).reshape(B, S, D)
    y = attn @ wfc.T + bfc + src
    mu = jnp.mean(y, axis=-1, keepdims=True)
    var = jnp.mean((y - mu) ** 2, axis=-1, keepdims=True)
    return (y - mu) * jax.lax.rsqrt(var + 1e-5)


if __name__ == "__main__":
    batch_size = 2
    max_seq_length = 8
    num_heads = 4
    hidden_size = 8
    d_model = num_heads * hidden_size  # 32

    key = jax.random.PRNGKey(0)
    ks = jax.random.split(key, 9)
    dtype = jnp.float32  # torch module uses float16; f32 params + bf16 MXU operands here.

    src = jax.random.normal(ks[0], (batch_size, max_seq_length, d_model), dtype)
    wq = 0.05 * jax.random.normal(ks[1], (d_model, d_model), dtype)
    wk = 0.05 * jax.random.normal(ks[2], (d_model, d_model), dtype)
    wv = 0.05 * jax.random.normal(ks[3], (d_model, d_model), dtype)
    wfc = 0.05 * jax.random.normal(ks[4], (d_model, d_model), dtype)
    bq = 0.05 * jax.random.normal(ks[5], (d_model,), dtype)
    bk = 0.05 * jax.random.normal(ks[6], (d_model,), dtype)
    bv = 0.05 * jax.random.normal(ks[7], (d_model,), dtype)
    bfc = 0.05 * jax.random.normal(ks[8], (d_model,), dtype)
    # NOTE: qkv_matmul weights exist in the torch module but are unused when
    # fused_qkv=False (the default path implemented here), so they are omitted.

    out = attention_forward(src, wq, bq, wk, bk, wv, bv, wfc, bfc,
                            num_heads=num_heads, hidden_size=hidden_size)
    out = jax.block_until_ready(out)

    ref = attention_reference(src, wq, bq, wk, bk, wv, bv, wfc, bfc,
                              num_heads=num_heads, hidden_size=hidden_size)
    assert out.shape == (batch_size, max_seq_length, d_model)
    # Tolerance budget: bf16 MXU operands (f32 accumulate) + approx EUP reciprocal;
    # the original torch module runs in fp16, so this is within the model's precision.
    max_err = float(jnp.max(jnp.abs(out - ref)))
    assert jnp.allclose(out, ref, atol=2e-2, rtol=2e-2), \
        f"mismatch vs reference (max abs err {max_err})"

    print("KERNEL_OK")
</pallas_src>

<mosaic_0001>
module attributes {stable_mosaic.version = 11 : i64} {
  func.func @_attention_kernel(%arg0: i32, %arg1: i32, %arg2: memref<16x128xf32, #tpu.memory_space<vmem>>, %arg3: memref<16x128xf32, #tpu.memory_space<vmem>>, %arg4: memref<128x32xbf16, #tpu.memory_space<vmem>>, %arg5: memref<1x32xf32, #tpu.memory_space<vmem>>, %arg6: memref<128x64xbf16, #tpu.memory_space<vmem>>, %arg7: memref<1x64xf32, #tpu.memory_space<vmem>>, %arg8: memref<32x128xbf16, #tpu.memory_space<vmem>>, %arg9: memref<1x128xf32, #tpu.memory_space<vmem>>, %arg10: memref<16x128xf32, #tpu.memory_space<vmem>>, %arg11: memref<4x16x8xbf16, #tpu.memory_space<vmem>>, %arg12: memref<4x16x1xf32, #tpu.memory_space<vmem>>, %arg13: memref<4x16x1xf32, #tpu.memory_space<vmem>>, %arg14: memref<4x16x8xf32, #tpu.memory_space<vmem>>) attributes {dimension_semantics = [#tpu.dimension_semantics<parallel>, #tpu.dimension_semantics<arbitrary>], iteration_bounds = array<i64: 1, 1>, scalar_prefetch = 0 : i64, scratch_operands = 4 : i64, tpu.core_type = #tpu.core_type<tc>, window_params = [{transform_indices = @transform_0, window_bounds = array<i64: 16, 128>}, {transform_indices = @transform_1, window_bounds = array<i64: 16, 128>}, {pipeline_mode = #tpu.pipeline_mode<synchronous>, transform_indices = @transform_2, window_bounds = array<i64: 128, 32>}, {pipeline_mode = #tpu.pipeline_mode<synchronous>, transform_indices = @transform_3, window_bounds = array<i64: 1, 32>}, {pipeline_mode = #tpu.pipeline_mode<synchronous>, transform_indices = @transform_4, window_bounds = array<i64: 128, 64>}, {pipeline_mode = #tpu.pipeline_mode<synchronous>, transform_indices = @transform_5, window_bounds = array<i64: 1, 64>}, {pipeline_mode = #tpu.pipeline_mode<synchronous>, transform_indices = @transform_6, window_bounds = array<i64: 32, 128>}, {pipeline_mode = #tpu.pipeline_mode<synchronous>, transform_indices = @transform_7, window_bounds = array<i64: 1, 128>}, {transform_indices = @transform_8, window_bounds = array<i64: 16, 128>}]} {
    %c0_i32 = arith.constant 0 : i32
    %0 = arith.cmpi eq, %arg1, %c0_i32 : i32
    %1 = arith.extui %0 : i1 to i32
    %c0_i32_0 = arith.constant 0 : i32
    %2 = arith.cmpi ne, %1, %c0_i32_0 : i32
    scf.if %2 {
      %c0_33 = arith.constant 0 : index
      %c0_34 = arith.constant 0 : index
      %57 = vector.load %arg2[%c0_33, %c0_34] : memref<16x128xf32, #tpu.memory_space<vmem>>, vector<16x128xf32>
      %58 = arith.truncf %57 : vector<16x128xf32> to vector<16x128xbf16>
      %c0_35 = arith.constant 0 : index
      %c0_36 = arith.constant 0 : index
      %59 = vector.load %arg4[%c0_35, %c0_36] : memref<128x32xbf16, #tpu.memory_space<vmem>>, vector<128x32xbf16>
      %cst_37 = arith.constant dense<0.000000e+00> : vector<16x32xf32>
      %60 = tpu.matmul %58, %59, %cst_37 {dimension_numbers = #tpu.dot_dimension_numbers<[1], [0], [0], [1], [0, 0, 1, 1], [], []>} : vector<16x128xbf16>, vector<128x32xbf16>, vector<16x32xf32> -> vector<16x32xf32>
      %c0_38 = arith.constant 0 : index
      %c0_39 = arith.constant 0 : index
      %61 = vector.load %arg5[%c0_38, %c0_39] : memref<1x32xf32, #tpu.memory_space<vmem>>, vector<1x32xf32>
      %62 = vector.broadcast %61 : vector<1x32xf32> to vector<16x32xf32>
      %63 = arith.addf %60, %62 : vector<16x32xf32>
      %64 = arith.truncf %63 : vector<16x32xf32> to vector<16x32xbf16>
      %65 = vector.extract_strided_slice %64 {offsets = [0, 0], sizes = [16, 8], strides = [1, 1]} : vector<16x32xbf16> to vector<16x8xbf16>
      %66 = vector.extract_strided_slice %64 {offsets = [0, 8], sizes = [16, 8], strides = [1, 1]} : vector<16x32xbf16> to vector<16x8xbf16>
      %67 = vector.extract_strided_slice %64 {offsets = [0, 16], sizes = [16, 8], strides = [1, 1]} : vector<16x32xbf16> to vector<16x8xbf16>
      %68 = vector.extract_strided_slice %64 {offsets = [0, 24], sizes = [16, 8], strides = [1, 1]} : vector<16x32xbf16> to vector<16x8xbf16>
      %69 = vector.shape_cast %65 : vector<16x8xbf16> to vector<1x16x8xbf16>
      %70 = vector.shape_cast %66 : vector<16x8xbf16> to vector<1x16x8xbf16>
      %71 = vector.shape_cast %67 : vector<16x8xbf16> to vector<1x16x8xbf16>
      %72 = vector.shape_cast %68 : vector<16x8xbf16> to vector<1x16x8xbf16>
      %73 = tpu.concatenate %69, %70, %71, %72 in 0 : vector<1x16x8xbf16>, vector<1x16x8xbf16>, vector<1x16x8xbf16>, vector<1x16x8xbf16> -> vector<4x16x8xbf16>
      %c0_40 = arith.constant 0 : index
      %c0_41 = arith.constant 0 : index
      %c0_42 = arith.constant 0 : index
      %74 = vector.load %arg11[%c0_40, %c0_41, %c0_42] : memref<4x16x8xbf16, #tpu.memory_space<vmem>>, vector<4x16x8xbf16>
      tpu.vector_store %arg11[%c0_40, %c0_41, %c0_42], %73 {strides = array<i32>} : memref<4x16x8xbf16, #tpu.memory_space<vmem>>, vector<4x16x8xbf16>,
      %cst_43 = arith.constant 0xFF800000 : f32
      %75 = vector.broadcast %cst_43 : f32 to vector<4x16x1xf32>
      %c0_44 = arith.constant 0 : index
      %c0_45 = arith.constant 0 : index
      %c0_46 = arith.constant 0 : index
      %76 = vector.load %arg12[%c0_44, %c0_45, %c0_46] : memref<4x16x1xf32, #tpu.memory_space<vmem>>, vector<4x16x1xf32>
      tpu.vector_store %arg12[%c0_44, %c0_45, %c0_46], %75 {strides = array<i32>} : memref<4x16x1xf32, #tpu.memory_space<vmem>>, vector<4x16x1xf32>,
      %cst_47 = arith.constant 0.000000e+00 : f32
      %77 = vector.broadcast %cst_47 : f32 to vector<4x16x1xf32>
      %c0_48 = arith.constant 0 : index
      %c0_49 = arith.constant 0 : index
      %c0_50 = arith.constant 0 : index
      %78 = vector.load %arg13[%c0_48, %c0_49, %c0_50] : memref<4x16x1xf32, #tpu.memory_space<vmem>>, vector<4x16x1xf32>
      tpu.vector_store %arg13[%c0_48, %c0_49, %c0_50], %77 {strides = array<i32>} : memref<4x16x1xf32, #tpu.memory_space<vmem>>, vector<4x16x1xf32>,
      %cst_51 = arith.constant 0.000000e+00 : f32
      %79 = vector.broadcast %cst_51 : f32 to vector<4x16x8xf32>
      %c0_52 = arith.constant 0 : index
      %c0_53 = arith.constant 0 : index
      %c0_54 = arith.constant 0 : index
      %80 = vector.load %arg14[%c0_52, %c0_53, %c0_54] : memref<4x16x8xf32, #tpu.memory_space<vmem>>, vector<4x16x8xf32>
      tpu.vector_store %arg14[%c0_52, %c0_53, %c0_54], %79 {strides = array<i32>} : memref<4x16x8xf32, #tpu.memory_space<vmem>>, vector<4x16x8xf32>,
    } else {
    }
    %c0 = arith.constant 0 : index
    %c0_1 = arith.constant 0 : index
    %3 = vector.load %arg3[%c0, %c0_1] : memref<16x128xf32, #tpu.memory_space<vmem>>, vector<16x128xf32>
    %4 = arith.truncf %3 : vector<16x128xf32> to vector<16x128xbf16>
    %c0_2 = arith.constant 0 : index
    %c0_3 = arith.constant 0 : index
    %5 = vector.load %arg6[%c0_2, %c0_3] : memref<128x64xbf16, #tpu.memory_space<vmem>>, vector<128x64xbf16>
    %cst = arith.constant dense<0.000000e+00> : vector<16x64xf32>
    %6 = tpu.matmul %4, %5, %cst {dimension_numbers = #tpu.dot_dimension_numbers<[1], [0], [0], [1], [0, 0, 1, 1], [], []>} : vector<16x128xbf16>, vector<128x64xbf16>, vector<16x64xf32> -> vector<16x64xf32>
    %c0_4 = arith.constant 0 : index
    %c0_5 = arith.constant 0 : index
    %7 = vector.load %arg7[%c0_4, %c0_5] : memref<1x64xf32, #tpu.memory_space<vmem>>, vector<1x64xf32>
    %8 = vector.broadcast %7 : vector<1x64xf32> to vector<16x64xf32>
    %9 = arith.addf %6, %8 : vector<16x64xf32>
    %10 = arith.truncf %9 : vector<16x64xf32> to vector<16x64xbf16>
    %11 = vector.extract_strided_slice %10 {offsets = [0, 0], sizes = [16, 8], strides = [1, 1]} : vector<16x64xbf16> to vector<16x8xbf16>
    %12 = vector.extract_strided_slice %10 {offsets = [0, 8], sizes = [16, 8], strides = [1, 1]} : vector<16x64xbf16> to vector<16x8xbf16>
    %13 = vector.extract_strided_slice %10 {offsets = [0, 16], sizes = [16, 8], strides = [1, 1]} : vector<16x64xbf16> to vector<16x8xbf16>
    %14 = vector.extract_strided_slice %10 {offsets = [0, 24], sizes = [16, 8], strides = [1, 1]} : vector<16x64xbf16> to vector<16x8xbf16>
    %15 = vector.shape_cast %11 : vector<16x8xbf16> to vector<1x16x8xbf16>
    %16 = vector.shape_cast %12 : vector<16x8xbf16> to vector<1x16x8xbf16>
    %17 = vector.shape_cast %13 : vector<16x8xbf16> to vector<1x16x8xbf16>
    %18 = vector.shape_cast %14 : vector<16x8xbf16> to vector<1x16x8xbf16>
    %19 = tpu.concatenate %15, %16, %17, %18 in 0 : vector<1x16x8xbf16>, vector<1x16x8xbf16>, vector<1x16x8xbf16>, vector<1x16x8xbf16> -> vector<4x16x8xbf16>
    %20 = vector.extract_strided_slice %10 {offsets = [0, 32], sizes = [16, 8], strides = [1, 1]} : vector<16x64xbf16> to vector<16x8xbf16>
    %21 = vector.extract_strided_slice %10 {offsets = [0, 40], sizes = [16, 8], strides = [1, 1]} : vector<16x64xbf16> to vector<16x8xbf16>
    %22 = vector.extract_strided_slice %10 {offsets = [0, 48], sizes = [16, 8], strides = [1, 1]} : vector<16x64xbf16> to vector<16x8xbf16>
    %23 = vector.extract_strided_slice %10 {offsets = [0, 56], sizes = [16, 8], strides = [1, 1]} : vector<16x64xbf16> to vector<16x8xbf16>
    %24 = vector.shape_cast %20 : vector<16x8xbf16> to vector<1x16x8xbf16>
    %25 = vector.shape_cast %21 : vector<16x8xbf16> to vector<1x16x8xbf16>
    %26 = vector.shape_cast %22 : vector<16x8xbf16> to vector<1x16x8xbf16>
    %27 = vector.shape_cast %23 : vector<16x8xbf16> to vector<1x16x8xbf16>
    %28 = tpu.concatenate %24, %25, %26, %27 in 0 : vector<1x16x8xbf16>, vector<1x16x8xbf16>, vector<1x16x8xbf16>, vector<1x16x8xbf16> -> vector<4x16x8xbf16>
    %c0_6 = arith.constant 0 : index
    %c0_7 = arith.constant 0 : index
    %c0_8 = arith.constant 0 : index
    %29 = vector.load %arg11[%c0_6, %c0_7, %c0_8] : memref<4x16x8xbf16, #tpu.memory_space<vmem>>, vector<4x16x8xbf16>
    "tpu.trace_start"() <{level = 10 : i32, message = "hqd,hkd->hqk"}> : () -> ()
    %cst_9 = arith.constant dense<0.000000e+00> : vector<4x16x16xf32>
    %30 = tpu.matmul %29, %19, %cst_9 {dimension_numbers = #tpu.dot_dimension_numbers<[2], [2], [1], [1], [0, 0, 0, 1, 1, 1], [0], [0]>} : vector<4x16x8xbf16>, vector<4x16x8xbf16>, vector<4x16x16xf32> -> vector<4x16x16xf32>
    "tpu.trace_stop"() : () -> ()
    %c0_10 = arith.constant 0 : index
    %c0_11 = arith.constant 0 : index
    %c0_12 = arith.constant 0 : index
    %31 = vector.load %arg12[%c0_10, %c0_11, %c0_12] : memref<4x16x1xf32, #tpu.memory_space<vmem>>, vector<4x16x1xf32>
    %cst_13 = arith.constant dense<0xFF800000> : vector<4x16xf32>
    %32 = vector.multi_reduction <maximumf>, %30, %cst_13 [2] : vector<4x16x16xf32> to vector<4x16xf32>
    %33 = vector.shape_cast %32 : vector<4x16xf32> to vector<4x16x1xf32>
    %34 = arith.maximumf %31, %33 : vector<4x16x1xf32>
    %35 = arith.subf %31, %34 : vector<4x16x1xf32>
    %36 = math.exp %35 : vector<4x16x1xf32>
    %37 = vector.broadcast %34 : vector<4x16x1xf32> to vector<4x16x16xf32>
    %38 = arith.subf %30, %37 : vector<4x16x16xf32>
    %39 = math.exp %38 : vector<4x16x16xf32>
    %c0_14 = arith.constant 0 : index
    %c0_15 = arith.constant 0 : index
    %c0_16 = arith.constant 0 : index
    %40 = vector.load %arg13[%c0_14, %c0_15, %c0_16] : memref<4x16x1xf32, #tpu.memory_space<vmem>>, vector<4x16x1xf32>
    %41 = arith.mulf %36, %40 : vector<4x16x1xf32>
    %cst_17 = arith.constant dense<0.000000e+00> : vector<4x16xf32>
    %42 = vector.multi_reduction <add>, %39, %cst_17 [2] : vector<4x16x16xf32> to vector<4x16xf32>
    %43 = vector.shape_cast %42 : vector<4x16xf32> to vector<4x16x1xf32>
    %44 = arith.addf %41, %43 : vector<4x16x1xf32>
    %c0_18 = arith.constant 0 : index
    %c0_19 = arith.constant 0 : index
    %c0_20 = arith.constant 0 : index
    %45 = vector.load %arg13[%c0_18, %c0_19, %c0_20] : memref<4x16x1xf32, #tpu.memory_space<vmem>>, vector<4x16x1xf32>
    tpu.vector_store %arg13[%c0_18, %c0_19, %c0_20], %44 {strides = array<i32>} : memref<4x16x1xf32, #tpu.memory_space<vmem>>, vector<4x16x1xf32>,
    %c0_21 = arith.constant 0 : index
    %c0_22 = arith.constant 0 : index
    %c0_23 = arith.constant 0 : index
    %46 = vector.load %arg14[%c0_21, %c0_22, %c0_23] : memref<4x16x8xf32, #tpu.memory_space<vmem>>, vector<4x16x8xf32>
    %47 = vector.broadcast %36 : vector<4x16x1xf32> to vector<4x16x8xf32>
    %48 = arith.mulf %47, %46 : vector<4x16x8xf32>
    %49 = arith.truncf %39 : vector<4x16x16xf32> to vector<4x16x16xbf16>
    "tpu.trace_start"() <{level = 10 : i32, message = "hqk,hkd->hqd"}> : () -> ()
    %cst_24 = arith.constant dense<0.000000e+00> : vector<4x16x8xf32>
    %50 = tpu.matmul %49, %28, %cst_24 {dimension_numbers = #tpu.dot_dimension_numbers<[2], [1], [1], [2], [0, 0, 0, 1, 1, 2], [0], [0]>} : vector<4x16x16xbf16>, vector<4x16x8xbf16>, vector<4x16x8xf32> -> vector<4x16x8xf32>
    "tpu.trace_stop"() : () -> ()
    %51 = arith.addf %48, %50 : vector<4x16x8xf32>
    %c0_25 = arith.constant 0 : index
    %c0_26 = arith.constant 0 : index
    %c0_27 = arith.constant 0 : index
    %52 = vector.load %arg14[%c0_25, %c0_26, %c0_27] : memref<4x16x8xf32, #tpu.memory_space<vmem>>, vector<4x16x8xf32>
    tpu.vector_store %arg14[%c0_25, %c0_26, %c0_27], %51 {strides = array<i32>} : memref<4x16x8xf32, #tpu.memory_space<vmem>>, vector<4x16x8xf32>,
    %c0_28 = arith.constant 0 : index
    %c0_29 = arith.constant 0 : index
    %c0_30 = arith.constant 0 : index
    %53 = vector.load %arg12[%c0_28, %c0_29, %c0_30] : memref<4x16x1xf32, #tpu.memory_space<vmem>>, vector<4x16x1xf32>
    tpu.vector_store %arg12[%c0_28, %c0_29, %c0_30], %34 {strides = array<i32>} : memref<4x16x1xf32, #tpu.memory_space<vmem>>, vector<4x16x1xf32>,
    %c0_i32_31 = arith.constant 0 : i32
    %54 = arith.cmpi eq, %arg1, %c0_i32_31 : i32
    %55 = arith.extui %54 : i1 to i32
    %c0_i32_32 = arith.constant 0 : i32
    %56 = arith.cmpi ne, %55, %c0_i32_32 : i32
    scf.if %56 {
      %c0_33 = arith.constant 0 : index
      %c0_34 = arith.constant 0 : index
      %c0_35 = arith.constant 0 : index
      %57 = vector.load %arg14[%c0_33, %c0_34, %c0_35] : memref<4x16x8xf32, #tpu.memory_space<vmem>>, vector<4x16x8xf32>
      %c0_36 = arith.constant 0 : index
      %c0_37 = arith.constant 0 : index
      %c0_38 = arith.constant 0 : index
      %58 = vector.load %arg13[%c0_36, %c0_37, %c0_38] : memref<4x16x1xf32, #tpu.memory_space<vmem>>, vector<4x16x1xf32>
      %59 = tpu.reciprocal %58 {approx = true} : vector<4x16x1xf32> -> vector<4x16x1xf32>
      %60 = vector.broadcast %59 : vector<4x16x1xf32> to vector<4x16x8xf32>
      %61 = arith.mulf %57, %60 : vector<4x16x8xf32>
      %62 = vector.extract_strided_slice %61 {offsets = [0, 0, 0], sizes = [1, 16, 8], strides = [1, 1, 1]} : vector<4x16x8xf32> to vector<1x16x8xf32>
      %63 = vector.shape_cast %62 : vector<1x16x8xf32> to vector<16x8xf32>
      %64 = vector.extract_strided_slice %61 {offsets = [1, 0, 0], sizes = [1, 16, 8], strides = [1, 1, 1]} : vector<4x16x8xf32> to vector<1x16x8xf32>
      %65 = vector.shape_cast %64 : vector<1x16x8xf32> to vector<16x8xf32>
      %66 = vector.extract_strided_slice %61 {offsets = [2, 0, 0], sizes = [1, 16, 8], strides = [1, 1, 1]} : vector<4x16x8xf32> to vector<1x16x8xf32>
      %67 = vector.shape_cast %66 : vector<1x16x8xf32> to vector<16x8xf32>
      %68 = vector.extract_strided_slice %61 {offsets = [3, 0, 0], sizes = [1, 16, 8], strides = [1, 1, 1]} : vector<4x16x8xf32> to vector<1x16x8xf32>
      %69 = vector.shape_cast %68 : vector<1x16x8xf32> to vector<16x8xf32>
      %70 = tpu.concatenate %63, %65, %67, %69 in 1 : vector<16x8xf32>, vector<16x8xf32>, vector<16x8xf32>, vector<16x8xf32> -> vector<16x32xf32>
      %71 = arith.truncf %70 : vector<16x32xf32> to vector<16x32xbf16>
      %c0_39 = arith.constant 0 : index
      %c0_40 = arith.constant 0 : index
      %72 = vector.load %arg8[%c0_39, %c0_40] : memref<32x128xbf16, #tpu.memory_space<vmem>>, vector<32x128xbf16>
      %cst_41 = arith.constant dense<0.000000e+00> : vector<16x128xf32>
      %73 = tpu.matmul %71, %72, %cst_41 {dimension_numbers = #tpu.dot_dimension_numbers<[1], [0], [0], [1], [0, 0, 1, 1], [], []>} : vector<16x32xbf16>, vector<32x128xbf16>, vector<16x128xf32> -> vector<16x128xf32>
      %c0_42 = arith.constant 0 : index
      %c0_43 = arith.constant 0 : index
      %74 = vector.load %arg9[%c0_42, %c0_43] : memref<1x128xf32, #tpu.memory_space<vmem>>, vector<1x128xf32>
      %75 = vector.broadcast %74 : vector<1x128xf32> to vector<16x128xf32>
      %76 = arith.addf %73, %75 : vector<16x128xf32>
      %c0_44 = arith.constant 0 : index
      %c0_45 = arith.constant 0 : index
      %77 = vector.load %arg2[%c0_44, %c0_45] : memref<16x128xf32, #tpu.memory_space<vmem>>, vector<16x128xf32>
      %78 = arith.addf %76, %77 : vector<16x128xf32>
      %79 = tpu.iota {dimensions = array<i32: 1>} : vector<16x128xi32>
      %c32_i32 = arith.constant 32 : i32
      %80 = vector.broadcast %c32_i32 : i32 to vector<16x128xi32>
      %81 = arith.cmpi slt, %79, %80 : vector<16x128xi32>
      %cst_46 = arith.constant dense<0.000000e+00> : vector<16xf32>
      %82 = vector.multi_reduction <add>, %78, %cst_46 [1] : vector<16x128xf32> to vector<16xf32>
      %83 = vector.shape_cast %82 : vector<16xf32> to vector<16x1xf32>
      %cst_47 = arith.constant 3.125000e-02 : f32
      %84 = vector.broadcast %cst_47 : f32 to vector<16x1xf32>
      %85 = arith.mulf %83, %84 : vector<16x1xf32>
      %86 = vector.broadcast %85 : vector<16x1xf32> to vector<16x128xf32>
      %87 = arith.subf %78, %86 : vector<16x128xf32>
      %cst_48 = arith.constant 0.000000e+00 : f32
      %88 = vector.broadcast %cst_48 : f32 to vector<16x128xf32>
      %89 = arith.select %81, %87, %88 : vector<16x128xi1>, vector<16x128xf32>
      %90 = arith.mulf %89, %89 : vector<16x128xf32>
      %cst_49 = arith.constant dense<0.000000e+00> : vector<16xf32>
      %91 = vector.multi_reduction <add>, %90, %cst_49 [1] : vector<16x128xf32> to vector<16xf32>
      %92 = vector.shape_cast %91 : vector<16xf32> to vector<16x1xf32>
      %cst_50 = arith.constant 3.125000e-02 : f32
      %93 = vector.broadcast %cst_50 : f32 to vector<16x1xf32>
      %94 = arith.mulf %92, %93 : vector<16x1xf32>
      %cst_51 = arith.constant 9.99999974E-6 : f32
      %95 = vector.broadcast %cst_51 : f32 to vector<16x1xf32>
      %96 = arith.addf %94, %95 : vector<16x1xf32>
      %97 = math.rsqrt %96 : vector<16x1xf32>
      %98 = vector.broadcast %97 : vector<16x1xf32> to vector<16x128xf32>
      %99 = arith.mulf %89, %98 : vector<16x128xf32>
      %c0_52 = arith.constant 0 : index
      %c0_53 = arith.constant 0 : index
      %100 = vector.load %arg10[%c0_52, %c0_53] : memref<16x128xf32, #tpu.memory_space<vmem>>, vector<16x128xf32>
      tpu.vector_store %arg10[%c0_52, %c0_53], %99 {strides = array<i32>} : memref<16x128xf32, #tpu.memory_space<vmem>>, vector<16x128xf32>,
    } else {
    }
    return
  }
  func.func @transform_0(%arg0: i32, %arg1: i32) -> (i32, i32) {
    %c0_i32 = arith.constant 0 : i32
    %c0_i32_0 = arith.constant 0 : i32
    return %arg0, %c0_i32 : i32, i32
  }
  func.func @transform_1(%arg0: i32, %arg1: i32) -> (i32, i32) {
    %c0_i32 = arith.constant 0 : i32
    %c0_i32_0 = arith.constant 0 : i32
    return %arg1, %c0_i32 : i32, i32
  }
  func.func @transform_2(%arg0: i32, %arg1: i32) -> (i32, i32) {
    %c0_i32 = arith.constant 0 : i32
    %c0_i32_0 = arith.constant 0 : i32
    %c0_i32_1 = arith.constant 0 : i32
    return %c0_i32, %c0_i32_0 : i32, i32
  }
  func.func @transform_3(%arg0: i32, %arg1: i32) -> (i32, i32) {
    %c0_i32 = arith.constant 0 : i32
    %c0_i32_0 = arith.constant 0 : i32
    %c0_i32_1 = arith.constant 0 : i32
    return %c0_i32, %c0_i32_0 : i32, i32
  }
  func.func @transform_4(%arg0: i32, %arg1: i32) -> (i32, i32) {
    %c0_i32 = arith.constant 0 : i32
    %c0_i32_0 = arith.constant 0 : i32
    %c0_i32_1 = arith.constant 0 : i32
    return %c0_i32, %c0_i32_0 : i32, i32
  }
  func.func @transform_5(%arg0: i32, %arg1: i32) -> (i32, i32) {
    %c0_i32 = arith.constant 0 : i32
    %c0_i32_0 = arith.constant 0 : i32
    %c0_i32_1 = arith.constant 0 : i32
    return %c0_i32, %c0_i32_0 : i32, i32
  }
  func.func @transform_6(%arg0: i32, %arg1: i32) -> (i32, i32) {
    %c0_i32 = arith.constant 0 : i32
    %c0_i32_0 = arith.constant 0 : i32
    %c0_i32_1 = arith.constant 0 : i32
    return %c0_i32, %c0_i32_0 : i32, i32
  }
  func.func @transform_7(%arg0: i32, %arg1: i32) -> (i32, i32) {
    %c0_i32 = arith.constant 0 : i32
    %c0_i32_0 = arith.constant 0 : i32
    %c0_i32_1 = arith.constant 0 : i32
    return %c0_i32, %c0_i32_0 : i32, i32
  }
  func.func @transform_8(%arg0: i32, %arg1: i32) -> (i32, i32) {
    %c0_i32 = arith.constant 0 : i32
    %c0_i32_0 = arith.constant 0 : i32
    return %arg0, %c0_i32 : i32, i32
  }
}

</mosaic_0001>

<bundles_post_ra>
// kernel: tpu_custom_call.1
= control target key start
LH: loop header
LB: loop body
LE: loop exit
PB: predicated region body
PF: predicated region fallthrough
CT: control target
= control target key end

     0   :  { %v1544_v1 = vmov 0.0   ;;  %vm1545_vm0 = vmmov 0   ;;  %s1997_s0 = inlined_call_operand.vmem [shape: f32[16,128], index: 0, kind: input, shape index: {}]   ;;  %s1998_s1 = inlined_call_operand.vmem [shape: f32[16,128], index: 1, kind: input, shape index: {}]   ;;  %s1999_s2 = inlined_call_operand.vmem [shape: bf16[128,32], index: 2, kind: input, shape index: {}]   ;;  %s2000_s3 = inlined_call_operand.vmem [shape: f32[1,32], index: 3, kind: input, shape index: {}]   ;;  %s2001_s4 = inlined_call_operand.vmem [shape: bf16[128,64], index: 4, kind: input, shape index: {}]   ;;  %s2002_s5 = inlined_call_operand.vmem [shape: f32[1,64], index: 5, kind: input, shape index: {}]   ;;  %s2003_s6 = inlined_call_operand.vmem [shape: bf16[32,128], index: 6, kind: input, shape index: {}]   ;;  %s2004_s7 = inlined_call_operand.vmem [shape: f32[1,128], index: 7, kind: input, shape index: {}]   ;;  %s2005_s8 = inlined_call_operand.hbm [shape: f32[16,128], index: 8, kind: output, shape index: {}]  }
   0x1   :  { %v1446_v0 = vld [vmem:[%s1999_s2 + $0x38] sm:$0xff]   ;;  %1320 = vmatprep.subr.bf16.mxu0 %v1544_v1  ;;  %1340 = vmatprep.subr.bf16.mxu1 %v1544_v1  ;;  %v1448_v3 = vld [vmem:[%s1999_s2 + $0x30] sm:$0xff]   ;;  %v1450_v5 = vld [vmem:[%s1999_s2 + $0x28] sm:$0xff]  }
   0x2   :  { %v1447_v2 = vld [vmem:[%s2001_s4 + $0x38] sm:$0xff]   ;;  %1321 = vmatpush3.bf16.msra.mxu0 %v1446_v0  ;;  %1336 = vmatprep.mubr.msk.bf16.mxu0 %vm1545_vm0, %v1544_v1  ;;  %v1449_v4 = vld [vmem:[%s2001_s4 + $0x30] sm:$0xff]   ;;  %v1451_v6 = vld [vmem:[%s2001_s4 + $0x28] sm:$0xff]  }
   0x3   :  { %1341 = vmatpush3.bf16.msra.mxu1 %v1447_v2  ;;  %1322 = vmatprep.subr.bf16.mxu0 %v1544_v1  ;;  %v1452_v7 = vld [vmem:[%s1999_s2 + $0x20] sm:$0xff]   ;;  %v1454_v9 = vld [vmem:[%s1999_s2 + $0x18] sm:$0xff]   ;;  %v1456_v11 = vld [vmem:[%s1999_s2 + $0x10] sm:$0xff]  }
   0x4   :  { %1342 = vmatprep.subr.bf16.mxu1 %v1544_v1  ;;  %1356 = vmatprep.mubr.msk.bf16.mxu1 %vm1545_vm0, %v1544_v1  ;;  %v1453_v8 = vld [vmem:[%s2001_s4 + $0x20] sm:$0xff]   ;;  %v1455_v10 = vld [vmem:[%s2001_s4 + $0x18] sm:$0xff]   ;;  %v1457_v12 = vld [vmem:[%s2001_s4 + $0x10] sm:$0xff]  }
   0x6   :  { %1323 = vmatpush3.bf16.msra.mxu0 %v1448_v3 }
   0x7   :  { %1343 = vmatpush3.bf16.msra.mxu1 %v1449_v4  ;;  %1324 = vmatprep.subr.bf16.mxu0 %v1544_v1 }
   0x8   :  { %1344 = vmatprep.subr.bf16.mxu1 %v1544_v1 }
   0xa   :  { %1325 = vmatpush3.bf16.msra.mxu0 %v1450_v5 }
   0xb   :  { %1345 = vmatpush3.bf16.msra.mxu1 %v1451_v6  ;;  %1326 = vmatprep.subr.bf16.mxu0 %v1544_v1 }
   0xc   :  { %1346 = vmatprep.subr.bf16.mxu1 %v1544_v1 }
   0xe   :  { %1327 = vmatpush3.bf16.msra.mxu0 %v1452_v7 }
   0xf   :  { %1347 = vmatpush3.bf16.msra.mxu1 %v1453_v8  ;;  %1328 = vmatprep.subr.bf16.mxu0 %v1544_v1 }
  0x10   :  { %1348 = vmatprep.subr.bf16.mxu1 %v1544_v1 }
  0x12   :  { %1329 = vmatpush3.bf16.msra.mxu0 %v1454_v9 }
  0x13   :  { %1349 = vmatpush3.bf16.msra.mxu1 %v1455_v10  ;;  %1330 = vmatprep.subr.bf16.mxu0 %v1544_v1 }
  0x14   :  { %13 = vsyncpa [#allocation7], 0  ;;  %1350 = vmatprep.subr.bf16.mxu1 %v1544_v1  ;;  %v1458_v13 = vld [vmem:[%s1999_s2 + $0x8] sm:$0xff]   ;;  %v1460_v15 = vld [vmem:[%s1999_s2] sm:$0xff]   ;;  %vm208_vm1 = vcmask 64512   ;;  %vm182_vm2 = vcmask 60416  }
  0x15   :  { %v1459_v14 = vld [vmem:[%s2001_s4 + $0x8] sm:$0xff]   ;;  %v35_v16 = vld [vmem:[%s1997_s0] sm:$0xff]  ;;  %209 = vst.msk [vmem:[#allocation5] sm:$0xff] %vm208_vm1, %v1544_v1  ;;  %210 = vst.msk [vmem:[#allocation5 + $0x8] sm:$0xff] %vm208_vm1, %v1544_v1  ;;  %s1548_s24 = smov 104   ;;  %vm565_vm3 = vcmask 130048  }
  0x16   :  { %1331 = vmatpush3.bf16.msra.mxu0 %v1456_v11  ;;  %v36_v17 = vld [vmem:[%s1997_s0 + $0x8] sm:$0xff]  ;;  %v1461_v18 = vld [vmem:[%s2001_s4] sm:$0xff]   ;;  %211 = vst.msk [vmem:[#allocation5 + $0x10] sm:$0xff] %vm208_vm1, %v1544_v1  ;;  %212 = vst.msk [vmem:[#allocation5 + $0x18] sm:$0xff] %vm208_vm1, %v1544_v1  ;;  %vm191_vm4 = vcmask 7168   ;;  %v1549_v3 = vmov -inf  }
  0x17   :  { %1351 = vmatpush3.bf16.msra.mxu1 %v1457_v12  ;;  %1332 = vmatprep.subr.bf16.mxu0 %v1544_v1  ;;  %v217_v19 = vld [vmem:[%s1998_s1] sm:$0xff]  ;;  %v218_v20 = vld [vmem:[%s1998_s1 + $0x8] sm:$0xff]  ;;  %v37_v21 = vpack.c.bf16 %v36_v17, %v35_v16  ;;  %213 = vst.msk [vmem:[#allocation5 + $0x20] sm:$0xff] %vm208_vm1, %v1544_v1  ;;  %214 = vst.msk [vmem:[#allocation5 + $0x28] sm:$0xff] %vm208_vm1, %v1544_v1  ;;  %v1550_v5 = vmov 0   ;;  %s1551_s25 = smov 96  }
  0x18   :  { %1352 = vmatprep.subr.bf16.mxu1 %v1544_v1  ;;  %v219_v22 = vpack.c.bf16 %v218_v20, %v217_v19  ;;  %215 = vst.msk [vmem:[#allocation5 + $0x30] sm:$0xff] %vm208_vm1, %v1544_v1  ;;  %216 = vst.msk [vmem:[#allocation5 + $0x38] sm:$0xff] %vm208_vm1, %v1544_v1  ;;  %v1239_v23 = vld [vmem:[%s2000_s3] ss:$0 sm:$0xff]  ;;  %s1546_s3 = smov 112   ;;  %1429 = vset.pattern.permute.xlu1 %v1550_v5  ;;  %s1552_s28 = smov 8  }
  0x19   :  { %v1256_v26 = vld [vmem:[%s2002_s5] ss:$0 sm:$0xff]  ;;  %s1547_s5 = smov 120   ;;  %192 = vst.msk [vmem:[#allocation3] sm:$0xff] %vm191_vm4, %v1549_v3  ;;  %193 = vst.msk [vmem:[#allocation3 + $0x8] sm:$0xff] %vm191_vm4, %v1549_v3  ;;  %1430 = vset.pattern.permute.xlu0 %v1550_v5  ;;  %s1553_s9 = smov 16  }
  0x1a   :  { %1333 = vmatpush3.bf16.msra.mxu0 %v1458_v13  ;;  %194 = vst.msk [vmem:[#allocation3 + $0x10] sm:$0xff] %vm191_vm4, %v1549_v3  ;;  %195 = vst.msk [vmem:[#allocation3 + $0x18] sm:$0xff] %vm191_vm4, %v1549_v3  ;;  %vm1118_vm5 = vcmask 195584   ;;  %vm1145_vm6 = vcmask 261120  }
  0x1b   :  { %1353 = vmatpush3.bf16.msra.mxu1 %v1459_v14  ;;  %1334 = vmatprep.subr.bf16.mxu0 %v1544_v1  ;;  %196 = vst.msk [vmem:[#allocation3 + $0x20] sm:$0xff] %vm191_vm4, %v1549_v3  ;;  %197 = vst.msk [vmem:[#allocation3 + $0x28] sm:$0xff] %vm191_vm4, %v1549_v3 }
  0x1c   :  { %1354 = vmatprep.subr.bf16.mxu1 %v1544_v1  ;;  %198 = vst.msk [vmem:[#allocation3 + $0x30] sm:$0xff] %vm191_vm4, %v1549_v3  ;;  %199 = vst.msk [vmem:[#allocation3 + $0x38] sm:$0xff] %vm191_vm4, %v1549_v3 }
  0x1d   :  { %200 = vst.msk [vmem:[#allocation4] sm:$0xff] %vm191_vm4, %v1544_v1  ;;  %201 = vst.msk [vmem:[#allocation4 + $0x8] sm:$0xff] %vm191_vm4, %v1544_v1 }
  0x1e   :  { %1335 = vmatpush3.bf16.msra.mxu0 %v1460_v15  ;;  %202 = vst.msk [vmem:[#allocation4 + $0x10] sm:$0xff] %vm191_vm4, %v1544_v1  ;;  %203 = vst.msk [vmem:[#allocation4 + $0x18] sm:$0xff] %vm191_vm4, %v1544_v1 }
  0x1f   :  { %1355 = vmatpush3.bf16.msra.mxu1 %v1461_v18  ;;  %1360 = vmatprep.subr.bf16.mxu0 %v1544_v1  ;;  %204 = vst.msk [vmem:[#allocation4 + $0x20] sm:$0xff] %vm191_vm4, %v1544_v1  ;;  %205 = vst.msk [vmem:[#allocation4 + $0x28] sm:$0xff] %vm191_vm4, %v1544_v1 }
  0x20   :  { %1366 = vmatprep.subr.bf16.mxu1 %v1544_v1  ;;  %206 = vst.msk [vmem:[#allocation4 + $0x30] sm:$0xff] %vm191_vm4, %v1544_v1  ;;  %207 = vst.msk [vmem:[#allocation4 + $0x38] sm:$0xff] %vm191_vm4, %v1544_v1 }
  0x21   :  { %1337 = vmatmul.mubr.bf16.vlgmr.msra.gmra.mxu0 %v37_v21 }
  0x22   :  { %1357 = vmatmul.mubr.bf16.vlgmr.msra.gmra.mxu1 %v219_v22  ;;  %1362 = vmatprep.mubr.msk.bf16.mxu0 %vm1545_vm0, %v1544_v1 }
  0x23   :  { %1368 = vmatprep.mubr.msk.bf16.mxu1 %vm1545_vm0, %v1544_v1 }
  0xe1   :  { %v143_v24 = vpop.f32.mrf.mxu0 }
  0xe2   :  { %v144_v25 = vadd.f32 %v1239_v23, %v143_v24  ;;  %v325_v27 = vpop.f32.mrf.mxu1  ;;  %v1809_v24 = vld [vmem:[#allocation3] sm:$0xff] }
  0xe3   :  { %v1338_v28 = vpop.f32.mrf.mxu0  ;;  %v326_v31 = vadd.f32 %v1256_v26, %v325_v27  ;;  %v1814_v27 = vld [vmem:[#allocation3 + $0x8] sm:$0xff] }
  0xe4   :  { %v1281_v29 = vpack.c.bf16 %v144_v25, %v144_v25  ;;  %v1358_v30 = vpop.f32.mrf.mxu1 }
  0xe5   :  { %v146_v32 = vpop.f32.mrf.mxu0 }
  0xe6   :  { %183 = vst.msk [vmem:[#allocation2] sm:$0xf] %vm182_vm2, %v1281_v29  ;;  %v147_v33 = vadd.f32 %v1239_v23, %v146_v32  ;;  %v328_v34 = vpop.f32.mrf.mxu1  ;;  %v1831_v32 = vld [vmem:[#allocation3 + $0x10] sm:$0xff] }
  0xe7   :  { %v329_v35 = vadd.f32 %v1256_v26, %v328_v34  ;;  %v1339_v36 = vpop.f32.mrf.mxu0 }
  0xe8   :  { %v150_v37 = vpack.c.bf16 %v147_v33, %v144_v25  ;;  %v1282_v38 = vpack.c.bf16 %v147_v33, %v147_v33  ;;  %v1359_v39 = vpop.f32.mrf.mxu1  ;;  %v1838_v36 = vld [vmem:[#allocation3 + $0x20] sm:$0xff] }
  0xe9   :  { %v1711_v40 = vpack.c.bf16 %v329_v35, %v326_v31  ;;  %v1836_v35 = vld [vmem:[#allocation3 + $0x18] sm:$0xff] }
  0xea   :  { %184 = vst.msk [vmem:[#allocation2 + $0x4] sm:$0xf] %vm182_vm2, %v1282_v38  ;;  %154 = vrot.lane.b32.xlu1 %v150_v37, %s1546_s3  ;;  %152 = vrot.lane.b32.xlu0 %v150_v37, %s1547_s5 }
  0xeb   :  { %v358_v41 = vsel %vm208_vm1, %v1711_v40, 0 }
  0xec   :  { %1361 = vmatpush3.bf16.xpose.msra.mxu0 %v358_v41 }
  0xed   :  { %1372 = vmatprep.subr.bf16.mxu0 %v1544_v1 }
  0xee   :  { %156 = vrot.lane.b32.xlu1 %v150_v37, %s1548_s24  ;;  %334 = vrot.lane.b32.xlu0 %v1711_v40, %s1547_s5 }
  0xf1   :  { %v1462_v42 = vld [vmem:[#allocation2] sm:$0xff]  }
  0xf2   :  { %338 = vrot.lane.b32.xlu1 %v1711_v40, %s1548_s24  ;;  %336 = vrot.lane.b32.xlu0 %v1711_v40, %s1546_s3 }
  0xf3   :  { %1363 = vmatmul.mubr.msk.bf16.vlgmr.msra.gmra.mxu0 %vm208_vm1, %v1462_v42 }
  0xf4   :  { %1374 = vmatprep.mubr.msk.bf16.mxu0 %vm1545_vm0, %v1544_v1 }
 0x15c   :  { %v155_v43 = vpop.permute.xlu1 %154  ;;  %v153_v44 = vpop.permute.xlu0 %152 }
 0x15d   :  { %v1252_v45 = vcombine.low %v155_v43, %v155_v43  ;;  %v1253_v46 = vcombine.high %v155_v43, %v155_v43  ;;  %v1250_v47 = vcombine.low %v153_v44, %v153_v44  ;;  %v1251_v48 = vcombine.high %v153_v44, %v153_v44  ;;  %v1851_v43 = vld [vmem:[#allocation3 + $0x30] sm:$0xff]  ;;  %v1853_v44 = vld [vmem:[#allocation3 + $0x28] sm:$0xff] }
 0x15f   :  { %187 = vst.msk [vmem:[#allocation2 + $0x10] sm:$0xf] %vm182_vm2, %v1252_v45  ;;  %188 = vst.msk [vmem:[#allocation2 + $0x14] sm:$0xf] %vm182_vm2, %v1253_v46 }
 0x160   :  { %185 = vst.msk [vmem:[#allocation2 + $0x8] sm:$0xf] %vm182_vm2, %v1250_v47  ;;  %186 = vst.msk [vmem:[#allocation2 + $0xc] sm:$0xf] %vm182_vm2, %v1251_v48  ;;  %v157_v49 = vpop.permute.xlu1 %156  ;;  %v1727_v50 = vpop.permute.xlu0 %334 }
 0x161   :  { %v1254_v51 = vcombine.low %v157_v49, %v157_v49  ;;  %v1255_v52 = vcombine.high %v157_v49, %v157_v49  ;;  %v410_v53 = vsel %vm208_vm1, %v1727_v50, 0 }
 0x162   :  { %1367 = vmatpush3.bf16.xpose.msra.mxu1 %v410_v53 }
 0x163   :  { %189 = vst.msk [vmem:[#allocation2 + $0x18] sm:$0xf] %vm182_vm2, %v1254_v51  ;;  %190 = vst.msk [vmem:[#allocation2 + $0x1c] sm:$0xf] %vm182_vm2, %v1255_v52  ;;  %1378 = vmatprep.subr.bf16.mxu1 %v1544_v1  ;;  %v1870_v52 = vld [vmem:[#allocation3 + $0x38] sm:$0xff] }
 0x164   :  { %v1734_v54 = vpop.permute.xlu0 %336  ;;  %v1738_v56 = vpop.permute.xlu1 %338 }
 0x165   :  { %v462_v55 = vsel %vm208_vm1, %v1734_v54, 0  ;;  %v514_v58 = vsel %vm208_vm1, %v1738_v56, 0 }
 0x166   :  { %1373 = vmatpush3.bf16.xpose.msra.mxu0 %v462_v55  ;;  %v1464_v59 = vld [vmem:[#allocation2 + $0x10] sm:$0xff]  }
 0x167   :  { %v1463_v57 = vld [vmem:[#allocation2 + $0x8] sm:$0xff]   ;;  %1384 = vmatprep.subr.bf16.mxu0 %v1544_v1 }
 0x169   :  { %1369 = vmatmul.mubr.msk.bf16.vlgmr.msra.gmra.mxu1 %vm208_vm1, %v1463_v57 }
 0x16a   :  { %1379 = vmatpush3.bf16.xpose.msra.mxu1 %v514_v58  ;;  %1380 = vmatprep.mubr.msk.bf16.mxu1 %vm1545_vm0, %v1544_v1  ;;  %v1465_v60 = vld [vmem:[#allocation2 + $0x18] sm:$0xff]  }
 0x16b   :  { %1390 = vmatprep.subr.bf16.mxu1 %v1544_v1 }
 0x16d   :  { %1375 = vmatmul.mubr.msk.bf16.vlgmr.msra.gmra.mxu0 %vm208_vm1, %v1464_v59 }
 0x16e   :  { %1386 = vmatprep.mubr.msk.bf16.mxu0 %vm1545_vm0, %v1544_v1 }
 0x171   :  { %1381 = vmatmul.mubr.msk.bf16.vlgmr.msra.gmra.mxu1 %vm208_vm1, %v1465_v60 }
 0x172   :  { %1392 = vmatprep.mubr.msk.bf16.mxu1 %vm1545_vm0, %v1544_v1 }
 0x1b3   :  { %v1753_v61 = vpop.f32.mrf.mxu0 }
 0x1b4   :  { %v566_v62 = vsel %vm565_vm3, %v1753_v61, -inf }
 0x1b5   :  { %567 = vmax.xlane.f32.xlu0 %v566_v62  ;;  %v1364_v63 = vpop.f32.mrf.mxu0 }
 0x1b7   :  { %v1757_v0 = vpop.f32.mrf.mxu0 }
 0x1b8   :  { %v569_v2 = vsel %vm565_vm3, %v1757_v0, -inf }
 0x1b9   :  { %570 = vmax.xlane.f32.xlu1 %v569_v2  ;;  %v1365_v4 = vpop.f32.mrf.mxu0 }
 0x229   :  { %v1785_v6 = vpop.f32.mrf.mxu1 }
 0x22a   :  { %v572_v7 = vsel %vm565_vm3, %v1785_v6, -inf }
 0x22b   :  { %v1370_v8 = vpop.f32.mrf.mxu1  ;;  %573 = vmax.xlane.f32.xlu0 %v572_v7 }
 0x22d   :  { %v1789_v9 = vpop.f32.mrf.mxu1  ;;  %v1791_v10 = vpop.f32.mrf.mxu0 }
 0x22e   :  { %v575_v11 = vsel %vm565_vm3, %v1789_v9, -inf  ;;  %v578_v12 = vsel %vm565_vm3, %v1791_v10, -inf }
 0x22f   :  { %v1371_v13 = vpop.f32.mrf.mxu1  ;;  %576 = vmax.xlane.f32.xlu0 %v575_v11  ;;  %579 = vmax.xlane.f32.xlu1 %v578_v12  ;;  %v1376_v14 = vpop.f32.mrf.mxu0 }
 0x231   :  { %v1797_v15 = vpop.f32.mrf.mxu0  ;;  %v1799_v16 = vpop.f32.mrf.mxu1 }
 0x232   :  { %v584_v17 = vsel %vm565_vm3, %v1799_v16, -inf  ;;  %v581_v18 = vsel %vm565_vm3, %v1797_v15, -inf }
 0x233   :  { %v1382_v19 = vpop.f32.mrf.mxu1  ;;  %585 = vmax.xlane.f32.xlu1 %v584_v17  ;;  %582 = vmax.xlane.f32.xlu0 %v581_v18  ;;  %v1377_v20 = vpop.f32.mrf.mxu0 }
 0x235   :  { %v1805_v21 = vpop.f32.mrf.mxu1 }
 0x236   :  { %v587_v22 = vsel %vm565_vm3, %v1805_v21, -inf }
 0x237   :  { %v1383_v23 = vpop.f32.mrf.mxu1  ;;  %588 = vmax.xlane.f32.xlu0 %v587_v22 }
 0x23e   :  { %v568_v25 = vpop.xlane.xlu0 %567 }
 0x23f   :  { %v1812_v26 = vmax.f32 %v1809_v24, %v568_v25 }
 0x241   :  { %v598_v28 = vsub.f32 %v1809_v24, %v1812_v26  ;;  %1007 = vst.msk [vmem:[#allocation3] sm:$0xff] %vm191_vm4, %v1812_v26 }
 0x242   :  { %v571_v29 = vpop.xlane.xlu1 %570 }
 0x243   :  { %v1821_v30 = vmax.f32 %v1814_v27, %v571_v29 }
 0x244   :  { %624 = vperm.xlu1 %1429, %v1812_v26  }
 0x245   :  { %v599_v31 = vsub.f32 %v1814_v27, %v1821_v30  ;;  %1008 = vst.msk [vmem:[#allocation3 + $0x8] sm:$0xff] %vm191_vm4, %v1821_v30 }
 0x24d   :  { %629 = vperm.xlu0 %1430, %v1821_v30   ;;  %v692_v30 = vld [vmem:[#allocation4 + $0x30] sm:$0xff] }
 0x251   :  { %897 = vrot.lane.b32.xlu0 %v1734_v54, %s1551_s25 }
 0x2b4   :  { %v574_v33 = vpop.xlane.xlu0 %573 }
 0x2b5   :  { %v1834_v34 = vmax.f32 %v1831_v32, %v574_v33 }
 0x2b7   :  { %v600_v37 = vsub.f32 %v1831_v32, %v1834_v34  ;;  %1009 = vst.msk [vmem:[#allocation3 + $0x10] sm:$0xff] %vm191_vm4, %v1834_v34  ;;  %634 = vperm.xlu1 %1429, %v1834_v34  }
 0x2b8   :  { %v577_v38 = vpop.xlane.xlu0 %576  ;;  %v580_v39 = vpop.xlane.xlu1 %579 }
 0x2b9   :  { %v1846_v41 = vmax.f32 %v1836_v35, %v577_v38  ;;  %v1849_v42 = vmax.f32 %v1838_v36, %v580_v39 }
 0x2bb   :  { %v601_v45 = vsub.f32 %v1836_v35, %v1846_v41  ;;  %1010 = vst.msk [vmem:[#allocation3 + $0x18] sm:$0xff] %vm191_vm4, %v1846_v41  ;;  %v602_v46 = vsub.f32 %v1838_v36, %v1849_v42  ;;  %1011 = vst.msk [vmem:[#allocation3 + $0x20] sm:$0xff] %vm191_vm4, %v1849_v42  ;;  %644 = vperm.xlu1 %1429, %v1849_v42  }
 0x2bc   :  { %v586_v47 = vpop.xlane.xlu1 %585  ;;  %v583_v48 = vpop.xlane.xlu0 %582 }
 0x2bd   :  { %v1865_v49 = vmax.f32 %v1851_v43, %v586_v47  ;;  %v1868_v51 = vmax.f32 %v1853_v44, %v583_v48  ;;  %v612_v34 = vmul.f32 1.442695, %v601_v45  ;;  %v688_v45 = vld [vmem:[#allocation4 + $0x10] sm:$0xff] }
 0x2bf   :  { %v604_v53 = vsub.f32 %v1851_v43, %v1865_v49  ;;  %1013 = vst.msk [vmem:[#allocation3 + $0x30] sm:$0xff] %vm191_vm4, %v1865_v49  ;;  %v603_v54 = vsub.f32 %v1853_v44, %v1868_v51  ;;  %1012 = vst.msk [vmem:[#allocation3 + $0x28] sm:$0xff] %vm191_vm4, %v1868_v51  ;;  %639 = vperm.xlu1 %1429, %v1846_v41   ;;  %v606_v43 = vmul.f32 1.442695, %v598_v28  ;;  %v691_v28 = vld [vmem:[#allocation4 + $0x28] sm:$0xff] }
 0x2c0   :  { %v589_v55 = vpop.xlane.xlu0 %588  ;;  %v625_v59 = vpop.permute.xlu1 %624 }
 0x2c1   :  { %v1882_v57 = vmax.f32 %v1870_v52, %v589_v55  ;;  %v662_v4 = vsub.f32 %v1753_v61, %v625_v59  ;;  %v616_v32 = vmul.f32 1.442695, %v603_v54  ;;  %v618_v36 = vmul.f32 1.442695, %v604_v53  ;;  %v690_v53 = vld [vmem:[#allocation4 + $0x20] sm:$0xff] }
 0x2c3   :  { %v605_v58 = vsub.f32 %v1870_v52, %v1882_v57  ;;  %1014 = vst.msk [vmem:[#allocation3 + $0x38] sm:$0xff] %vm191_vm4, %v1882_v57  ;;  %649 = vperm.xlu1 %1429, %v1868_v51  }
 0x2c7   :  { %654 = vperm.xlu1 %1429, %v1865_v49  }
 0x2c8   :  { %v630_v60 = vpop.permute.xlu0 %629 }
 0x2c9   :  { %v663_v2 = vsub.f32 %v1757_v0, %v630_v60 }
 0x2cb   :  { %659 = vperm.xlu1 %1429, %v1882_v57   ;;  %v672_v7 = vmul.f32 1.442695, %v663_v2  ;;  %v608_v57 = vmul.f32 1.442695, %v599_v31 }
 0x2cc   :  { %v898_v39 = vpop.permute.xlu0 %897 }
 0x2cf   :  { %803 = vrot.lane.b32.xlu1 %v1711_v40, %s1551_s25 }
 0x2d3   :  { %850 = vrot.lane.b32.xlu1 %v1727_v50, %s1551_s25  ;;  %v670_v50 = vmul.f32 1.442695, %v662_v4 }
 0x2d7   :  { %944 = vrot.lane.b32.xlu1 %v1738_v56, %s1551_s25 }
 0x332   :  { %v635_v62 = vpop.permute.xlu1 %634 }
 0x333   :  { %v664_v63 = vsub.f32 %v1785_v6, %v635_v62 }
 0x335   :  { %v674_v3 = vmul.f32 1.442695, %v664_v63 }
 0x336   :  { %v645_v5 = vpop.permute.xlu1 %644 }
 0x337   :  { %1468 = vpow2.f32 %v674_v3  ;;  %v666_v40 = vsub.f32 %v1791_v10, %v645_v5  ;;  %v610_v3 = vmul.f32 1.442695, %v600_v37  ;;  %v620_v37 = vmul.f32 1.442695, %v605_v58 }
 0x339   :  { %v678_v8 = vmul.f32 1.442695, %v666_v40 }
 0x33a   :  { %v640_v11 = vpop.permute.xlu1 %639 }
 0x33b   :  { %1470 = vpow2.f32 %v678_v8  ;;  %v665_v56 = vsub.f32 %v1789_v9, %v640_v11  ;;  %v689_v11 = vld [vmem:[#allocation4 + $0x18] sm:$0xff] }
 0x33c   :  { %1472 = vpow2.f32 %v672_v7  ;;  %v614_v7 = vmul.f32 1.442695, %v602_v46 }
 0x33d   :  { %v676_v12 = vmul.f32 1.442695, %v665_v56  ;;  %1474 = vpow2.f32 %v670_v50 }
 0x33e   :  { %v650_v6 = vpop.permute.xlu1 %649 }
 0x33f   :  { %1476 = vpow2.f32 %v676_v12  ;;  %v667_v0 = vsub.f32 %v1797_v15, %v650_v6 }
 0x341   :  { %v680_v13 = vmul.f32 1.442695, %v667_v0 }
 0x342   :  { %v655_v61 = vpop.permute.xlu1 %654 }
 0x343   :  { %1478 = vpow2.f32 %v680_v13  ;;  %v668_v14 = vsub.f32 %v1799_v16, %v655_v61 }
 0x344   :  { %v1469_v10 = vpop.eup %1468 }
 0x345   :  { %v682_v17 = vmul.f32 1.442695, %v668_v14  ;;  %v708_v18 = vsel %vm565_vm3, %v1469_v10, 0.0 }
 0x346   :  { %709 = vadd.xlane.f32.xlu0 %v708_v18  ;;  %v660_v19 = vpop.permute.xlu1 %659  ;;  %v693_v18 = vld [vmem:[#allocation4 + $0x38] sm:$0xff] }
 0x347   :  { %1480 = vpow2.f32 %v682_v17  ;;  %v669_v9 = vsub.f32 %v1805_v21, %v660_v19  ;;  %v686_v17 = vld [vmem:[#allocation4] sm:$0xff] }
 0x348   :  { %v1471_v20 = vpop.eup %1470 }
 0x349   :  { %v1473_v22 = vpop.eup %1472  ;;  %v684_v23 = vmul.f32 1.442695, %v669_v9  ;;  %v714_v25 = vsel %vm565_vm3, %v1471_v20, 0.0 }
 0x34a   :  { %715 = vadd.xlane.f32.xlu0 %v714_v25  ;;  %v804_v15 = vpop.permute.xlu1 %803  ;;  %v1475_v29 = vpop.eup %1474  ;;  %v705_v8 = vsel %vm565_vm3, %v1473_v22, 0.0 }
 0x34b   :  { %1482 = vpow2.f32 %v684_v23  ;;  %1385 = vmatpush3.bf16.msra.mxu0 %v804_v15  ;;  %v799_v33 = vpack.c.bf16 %v1473_v22, %v1475_v29  ;;  %v702_v4 = vsel %vm565_vm3, %v1475_v29, 0.0  ;;  %v687_v29 = vld [vmem:[#allocation4 + $0x8] sm:$0xff] }
 0x34c   :  { %v1477_v16 = vpop.eup %1476  ;;  %1396 = vmatprep.subr.bf16.mxu0 %v1544_v1  ;;  %1484 = vpow2.f32 %v610_v3 }
 0x34d   :  { %v711_v38 = vsel %vm565_vm3, %v1477_v16, 0.0  ;;  %v800_v48 = vpack.c.bf16 %v1477_v16, %v1469_v10  ;;  %1486 = vpow2.f32 %v614_v7 }
 0x34e   :  { %712 = vadd.xlane.f32.xlu1 %v711_v38  ;;  %v851_v47 = vpop.permute.xlu1 %850  ;;  %1387 = vmatmul.mubr.msk.bf16.vlgmr.msra.gmra.mxu0 %vm565_vm3, %v799_v33  ;;  %1488 = vpow2.f32 %v616_v32  ;;  %v745_v32 = vld [vmem:[#allocation5 + $0x10] sm:$0xff] }
 0x34f   :  { %1391 = vmatpush3.bf16.msra.mxu1 %v851_v47  ;;  %1397 = vmatpush3.bf16.msra.mxu0 %v898_v39  ;;  %1490 = vpow2.f32 %v612_v34 }
 0x350   :  { %v1479_v21 = vpop.eup %1478  ;;  %1402 = vmatprep.subr.bf16.mxu1 %v1544_v1  ;;  %1398 = vmatprep.mubr.msk.bf16.mxu0 %vm1545_vm0, %v1544_v1  ;;  %1492 = vpow2.f32 %v620_v37 }
 0x351   :  { %v717_v55 = vsel %vm565_vm3, %v1479_v21, 0.0  ;;  %1408 = vmatprep.subr.bf16.mxu0 %v1544_v1  ;;  %v801_v62 = vpack.c.bf16 %v1479_v21, %v1471_v20  ;;  %1494 = vpow2.f32 %v618_v36 }
 0x352   :  { %718 = vadd.xlane.f32.xlu0 %v717_v55  ;;  %1393 = vmatmul.mubr.msk.bf16.vlgmr.msra.gmra.mxu1 %vm565_vm3, %v800_v48  ;;  %v945_v59 = vpop.permute.xlu1 %944  ;;  %1496 = vpow2.f32 %v606_v43 }
 0x353   :  { %1403 = vmatpush3.bf16.msra.mxu1 %v945_v59  ;;  %1404 = vmatprep.mubr.msk.bf16.mxu1 %vm1545_vm0, %v1544_v1  ;;  %1498 = vpow2.f32 %v608_v57  ;;  %v748_v57 = vld [vmem:[#allocation5 + $0x28] sm:$0xff] }
 0x354   :  { %v1481_v60 = vpop.eup %1480 }
 0x355   :  { %v720_v63 = vsel %vm565_vm3, %v1481_v60, 0.0 }
 0x356   :  { %721 = vadd.xlane.f32.xlu1 %v720_v63  ;;  %1399 = vmatmul.mubr.msk.bf16.vlgmr.msra.gmra.mxu0 %vm565_vm3, %v801_v62 }
 0x357   :  { %1412 = vmatprep.mubr.msk.bf16.mxu0 %vm1545_vm0, %v1544_v1 }
 0x358   :  { %v1483_v2 = vpop.eup %1482 }
 0x359   :  { %v723_v5 = vsel %vm565_vm3, %v1483_v2, 0.0  ;;  %v802_v40 = vpack.c.bf16 %v1483_v2, %v1481_v60  ;;  %v1485_v42 = vpop.eup %1484 }
 0x35a   :  { %703 = vadd.xlane.f32.xlu1 %v702_v4  ;;  %724 = vadd.xlane.f32.xlu0 %v723_v5  ;;  %v1487_v44 = vpop.eup %1486  ;;  %v696_v49 = vmul.f32 %v1485_v42, %v688_v45 }
 0x35b   :  { %1405 = vmatmul.mubr.msk.bf16.vlgmr.msra.gmra.mxu1 %vm565_vm3, %v802_v40  ;;  %v1489_v46 = vpop.eup %1488  ;;  %v698_v58 = vmul.f32 %v1487_v44, %v690_v53 }
 0x35c   :  { %v1491_v51 = vpop.eup %1490  ;;  %v699_v0 = vmul.f32 %v1489_v46, %v691_v28 }
 0x35d   :  { %v1493_v35 = vpop.eup %1492  ;;  %v697_v24 = vmul.f32 %v1491_v51, %v689_v11  ;;  %v749_v11 = vld [vmem:[#allocation5 + $0x30] sm:$0xff] }
 0x35e   :  { %706 = vadd.xlane.f32.xlu0 %v705_v8  ;;  %v1495_v41 = vpop.eup %1494  ;;  %v701_v22 = vmul.f32 %v1493_v35, %v693_v18 }
 0x35f   :  { %v700_v61 = vmul.f32 %v1495_v41, %v692_v30  ;;  %v1497_v14 = vpop.eup %1496  ;;  %v750_v30 = vld [vmem:[#allocation5 + $0x38] sm:$0xff] }
 0x360   :  { %v694_v20 = vmul.f32 %v1497_v14, %v686_v17  ;;  %v1499_v23 = vpop.eup %1498 }
 0x361   :  { %v695_v39 = vmul.f32 %v1499_v23, %v687_v29 }
 0x36b   :  { %763 = vperm.xlu1 %1429, %v1485_v42  }
 0x36f   :  { %773 = vperm.xlu1 %1429, %v1487_v44  }
 0x373   :  { %778 = vperm.xlu1 %1429, %v1489_v46   ;;  %v747_v46 = vld [vmem:[#allocation5 + $0x20] sm:$0xff] }
 0x374   :  { %768 = vperm.xlu0 %1430, %v1491_v51   ;;  %v746_v51 = vld [vmem:[#allocation5 + $0x18] sm:$0xff] }
 0x377   :  { %788 = vperm.xlu1 %1429, %v1493_v35  }
 0x378   :  { %783 = vperm.xlu0 %1430, %v1495_v41  }
 0x3cf   :  { %v710_v52 = vpop.xlane.xlu0 %709 }
 0x3d0   :  { %v728_v54 = vadd.f32 %v710_v52, %v696_v49 }
 0x3d2   :  { %737 = vst.msk [vmem:[#allocation4 + $0x10] sm:$0xff] %vm191_vm4, %v728_v54 }
 0x3d3   :  { %v716_v50 = vpop.xlane.xlu0 %715 }
 0x3d4   :  { %v730_v56 = vadd.f32 %v716_v50, %v698_v58 }
 0x3d6   :  { %739 = vst.msk [vmem:[#allocation4 + $0x20] sm:$0xff] %vm191_vm4, %v730_v56 }
 0x3d7   :  { %v713_v26 = vpop.xlane.xlu1 %712 }
 0x3d8   :  { %v729_v12 = vadd.f32 %v713_v26, %v697_v24 }
 0x3d9   :  { %v1028_v6 = vld [vmem:[#allocation4 + $0x10] sm:$0xff] }
 0x3da   :  { %738 = vst.msk [vmem:[#allocation4 + $0x18] sm:$0xff] %vm191_vm4, %v729_v12  ;;  %1500 = vrcp.f32 %v1028_v6 }
 0x3db   :  { %v719_v27 = vpop.xlane.xlu0 %718 }
 0x3dc   :  { %v731_v31 = vadd.f32 %v719_v27, %v699_v0 }
 0x3dd   :  { %v1030_v13 = vld [vmem:[#allocation4 + $0x20] sm:$0xff] }
 0x3de   :  { %740 = vst.msk [vmem:[#allocation4 + $0x28] sm:$0xff] %vm191_vm4, %v731_v31  ;;  %1502 = vrcp.f32 %v1030_v13 }
 0x3df   :  { %v722_v10 = vpop.xlane.xlu1 %721 }
 0x3e0   :  { %v732_v19 = vadd.f32 %v722_v10, %v700_v61 }
 0x3e1   :  { %v1029_v9 = vld [vmem:[#allocation4 + $0x18] sm:$0xff] }
 0x3e2   :  { %741 = vst.msk [vmem:[#allocation4 + $0x30] sm:$0xff] %vm191_vm4, %v732_v19  ;;  %1504 = vrcp.f32 %v1029_v9 }
 0x3e3   :  { %v704_v25 = vpop.xlane.xlu1 %703  ;;  %v725_v15 = vpop.xlane.xlu0 %724 }
 0x3e4   :  { %v726_v16 = vadd.f32 %v704_v25, %v694_v20  ;;  %v733_v33 = vadd.f32 %v725_v15, %v701_v22 }
 0x3e5   :  { %v1031_v38 = vld [vmem:[#allocation4 + $0x28] sm:$0xff] }
 0x3e6   :  { %735 = vst.msk [vmem:[#allocation4] sm:$0xff] %vm191_vm4, %v726_v16  ;;  %742 = vst.msk [vmem:[#allocation4 + $0x38] sm:$0xff] %vm191_vm4, %v733_v33  ;;  %1506 = vrcp.f32 %v1031_v38 }
 0x3e7   :  { %v1501_v47 = vpop.eup %1500  ;;  %v707_v21 = vpop.xlane.xlu0 %706 }
 0x3e8   :  { %v727_v48 = vadd.f32 %v707_v21, %v695_v39  ;;  %1054 = vperm.xlu0 %1430, %v1501_v47   ;;  %v764_v8 = vpop.permute.xlu1 %763 }
 0x3e9   :  { %v1032_v55 = vld [vmem:[#allocation4 + $0x30] sm:$0xff]  ;;  %v793_v42 = vmul.f32 %v764_v8, %v745_v32  ;;  %v744_v32 = vld [vmem:[#allocation5 + $0x8] sm:$0xff] }
 0x3ea   :  { %736 = vst.msk [vmem:[#allocation4 + $0x8] sm:$0xff] %vm191_vm4, %v727_v48  ;;  %1508 = vrcp.f32 %v1032_v55 }
 0x3eb   :  { %v1503_v59 = vpop.eup %1502 }
 0x3ec   :  { %1064 = vperm.xlu0 %1430, %v1503_v59   ;;  %v774_v37 = vpop.permute.xlu1 %773 }
 0x3ed   :  { %v1033_v60 = vld [vmem:[#allocation4 + $0x38] sm:$0xff]  ;;  %v1026_v63 = vld [vmem:[#allocation4] sm:$0xff]  ;;  %v795_v52 = vmul.f32 %v774_v37, %v747_v46 }
 0x3ee   :  { %1510 = vrcp.f32 %v1033_v60  ;;  %v1467_v60 = vld [vmem:[%s2003_s6] sm:$0xff]  }
 0x3ef   :  { %v1505_v62 = vpop.eup %1504  ;;  %1512 = vrcp.f32 %v1026_v63  ;;  %v769_v44 = vpop.permute.xlu0 %768 }
 0x3f0   :  { %1059 = vperm.xlu1 %1429, %v1505_v62   ;;  %v779_v53 = vpop.permute.xlu1 %778  ;;  %v794_v54 = vmul.f32 %v769_v44, %v746_v51 }
 0x3f1   :  { %v1027_v3 = vld [vmem:[#allocation4 + $0x8] sm:$0xff]  ;;  %v796_v6 = vmul.f32 %v779_v53, %v748_v57 }
 0x3f2   :  { %1514 = vrcp.f32 %v1027_v3 }
 0x3f3   :  { %v1507_v2 = vpop.eup %1506  ;;  %v784_v56 = vpop.permute.xlu0 %783 }
 0x3f4   :  { %1069 = vperm.xlu1 %1429, %v1507_v2   ;;  %v797_v0 = vmul.f32 %v784_v56, %v749_v11  ;;  %v789_v31 = vpop.permute.xlu1 %788 }
 0x3f5   :  { %v798_v18 = vmul.f32 %v789_v31, %v750_v30  ;;  %v1277_v30 = vld [vmem:[%s2004_s7] ss:$0 sm:$0xff] }
 0x3f7   :  { %v1509_v4 = vpop.eup %1508 }
 0x3f8   :  { %1074 = vperm.xlu0 %1430, %v1509_v4  }
 0x3fb   :  { %v1511_v5 = vpop.eup %1510 }
 0x3fc   :  { %753 = vperm.xlu0 %1430, %v1497_v14   ;;  %1079 = vperm.xlu1 %1429, %v1511_v5   ;;  %v1513_v40 = vpop.eup %1512 }
 0x3ff   :  { %v1515_v7 = vpop.eup %1514 }
 0x400   :  { %1044 = vperm.xlu0 %1430, %v1513_v40   ;;  %758 = vperm.xlu1 %1429, %v1499_v23   ;;  %v1466_v23 = vld [vmem:[%s2003_s6 + $0x8] sm:$0xff]   ;;  %s1554_s6 = smov 24  }
 0x401   :  { %1409 = vmatpush3.bf16.msra.mxu0 %v1466_v23 }
 0x402   :  { %1410 = vmatprep.subr.bf16.mxu0 %v1544_v1  ;;  %v743_v1 = vld [vmem:[#allocation5] sm:$0xff] }
 0x404   :  { %1049 = vperm.xlu1 %1429, %v1515_v7  }
 0x405   :  { %1411 = vmatpush3.bf16.msra.mxu0 %v1467_v60 }
 0x40e   :  { %v1958_v34 = vpop.f32.mrf.mxu0 }
 0x410   :  { %v1388_v36 = vpop.f32.mrf.mxu0 }
 0x412   :  { %v1960_v35 = vpop.f32.mrf.mxu0  ;;  %v890_v41 = vpop.f32.mrf.mxu1 }
 0x413   :  { %v993_v45 = vadd.f32 %v890_v41, %v793_v42 }
 0x414   :  { %v1389_v43 = vpop.f32.mrf.mxu0  ;;  %v1394_v49 = vpop.f32.mrf.mxu1 }
 0x415   :  { %1001 = vst.msk [vmem:[#allocation5 + $0x10] sm:$0xff] %vm208_vm1, %v993_v45 }
 0x416   :  { %v893_v58 = vpop.f32.mrf.mxu1  ;;  %v937_v50 = vpop.f32.mrf.mxu0 }
 0x417   :  { %v994_v24 = vadd.f32 %v893_v58, %v794_v54  ;;  %v995_v26 = vadd.f32 %v937_v50, %v795_v52 }
 0x418   :  { %v1395_v28 = vpop.f32.mrf.mxu1  ;;  %v1400_v12 = vpop.f32.mrf.mxu0 }
 0x419   :  { %1002 = vst.msk [vmem:[#allocation5 + $0x18] sm:$0xff] %vm208_vm1, %v994_v24  ;;  %1003 = vst.msk [vmem:[#allocation5 + $0x20] sm:$0xff] %vm208_vm1, %v995_v26 }
 0x41a   :  { %v940_v27 = vpop.f32.mrf.mxu0 }
 0x41b   :  { %v996_v13 = vadd.f32 %v940_v27, %v796_v6  ;;  %v984_v61 = vpop.f32.mrf.mxu1 }
 0x41c   :  { %v997_v14 = vadd.f32 %v984_v61, %v797_v0  ;;  %v1401_v10 = vpop.f32.mrf.mxu0  ;;  %v1020_v25 = vld [vmem:[#allocation5 + $0x10] sm:$0xff] }
 0x41d   :  { %1004 = vst.msk [vmem:[#allocation5 + $0x28] sm:$0xff] %vm208_vm1, %v996_v13  ;;  %v1406_v17 = vpop.f32.mrf.mxu1 }
 0x41e   :  { %1005 = vst.msk [vmem:[#allocation5 + $0x30] sm:$0xff] %vm208_vm1, %v997_v14  ;;  %v1520_v14 = vld [vmem:[%s1997_s0] sm:$0xff] }
 0x41f   :  { %v987_v19 = vpop.f32.mrf.mxu1 }
 0x420   :  { %v998_v9 = vadd.f32 %v987_v19, %v798_v18  ;;  %v1021_v29 = vld [vmem:[#allocation5 + $0x18] sm:$0xff]  ;;  %v1022_v47 = vld [vmem:[#allocation5 + $0x20] sm:$0xff] }
 0x421   :  { %v1407_v20 = vpop.f32.mrf.mxu1 }
 0x422   :  { %1006 = vst.msk [vmem:[#allocation5 + $0x38] sm:$0xff] %vm208_vm1, %v998_v9  ;;  %v1521_v9 = vld [vmem:[%s1997_s0 + $0x8] sm:$0xff]  ;;  %s1555_s0 = smov [#allocation6]  }
 0x423   :  { %s1228_s7 = sshll.u32 %s1555_s0, 4  ;;  %s1229_s7 = int_to_ptr.vmem [resolvable:$true] %s1228_s7 }
 0x424   :  { %v1023_v48 = vld [vmem:[#allocation5 + $0x28] sm:$0xff]  ;;  %s1522_s16 = scalar_lea.vmem %s1229_s7, 256  ;;  %p1527_p1 = scmp.lt.s32.totalorder %s1229_s7, %s1229_s7 }
 0x425   :  { %v1024_v2 = vld [vmem:[#allocation5 + $0x30] sm:$0xff]  ;;  %p1523_p0 = scmp.ne.s32.totalorder %s1229_s7, %s1522_s16  ;;  %p1528_p2 = scmp.lt.s32.totalorder %s1522_s16, %s1522_s16 }
 0x427   :  { %p1529_p3 = por %p1528_p2, %p1527_p1 }
 0x429   :  { %v1025_v3 = vld [vmem:[#allocation5 + $0x38] sm:$0xff]  ;;  %p1530_p4 = pnand %p1529_p3, %p1523_p0 }
 0x463   :  { %v1055_v22 = vpop.permute.xlu0 %1054 }
 0x464   :  { %v1084_v16 = vmul.f32 %v1055_v22, %v1020_v25  ;;  %v1194_v22 = vlaneseq }
 0x466   :  { %v1195_v23 = vand.u32 127, %v1194_v22 }
 0x467   :  { %v1065_v38 = vpop.permute.xlu0 %1064 }
 0x468   :  { %v1086_v55 = vmul.f32 %v1065_v38, %v1022_v47  ;;  %vm1196_vm7 = vcmp.lt.s32.totalorder %v1195_v23, 32 }
 0x46b   :  { %v1060_v15 = vpop.permute.xlu1 %1059 }
 0x46c   :  { %v1085_v33 = vmul.f32 %v1060_v15, %v1021_v29 }
 0x46e   :  { %v1431_v39 = vpack.i.bf16 %v1085_v33, %v1084_v16 }
 0x46f   :  { %v1070_v21 = vpop.permute.xlu1 %1069 }
 0x470   :  { %v1087_v59 = vmul.f32 %v1070_v21, %v1023_v48  ;;  %1432 = vrot.lane.b32.xlu0 %v1431_v39, %s1552_s28 }
 0x472   :  { %v1436_v62 = vpack.i.bf16 %v1087_v59, %v1086_v55 }
 0x473   :  { %v1075_v63 = vpop.permute.xlu0 %1074 }
 0x474   :  { %1437 = vrot.lane.b32.xlu1 %v1436_v62, %s1553_s9  ;;  %v1088_v40 = vmul.f32 %v1075_v63, %v1024_v2 }
 0x477   :  { %v1080_v4 = vpop.permute.xlu1 %1079  ;;  %v754_v5 = vpop.permute.xlu0 %753 }
 0x478   :  { %v1089_v7 = vmul.f32 %v1080_v4, %v1025_v3  ;;  %v791_v8 = vmul.f32 %v754_v5, %v743_v1 }
 0x47a   :  { %v1441_v37 = vpack.i.bf16 %v1089_v7, %v1088_v40  ;;  %v991_v36 = vadd.f32 %v1958_v34, %v791_v8 }
 0x47b   :  { %v759_v42 = vpop.permute.xlu1 %758  ;;  %v1045_v51 = vpop.permute.xlu0 %1044 }
 0x47c   :  { %999 = vst.msk [vmem:[#allocation5] sm:$0xff] %vm208_vm1, %v991_v36  ;;  %v792_v44 = vmul.f32 %v759_v42, %v744_v32  ;;  %1442 = vrot.lane.b32.xlu0 %v1441_v37, %s1554_s6 }
 0x47e   :  { %v992_v46 = vadd.f32 %v1960_v35, %v792_v44 }
 0x47f   :  { %v1050_v41 = vpop.permute.xlu1 %1049 }
 0x480   :  { %1000 = vst.msk [vmem:[#allocation5 + $0x8] sm:$0xff] %vm208_vm1, %v992_v46 }
 0x483   :  { %v1018_v49 = vld [vmem:[#allocation5] sm:$0xff] }
 0x484   :  { %v1082_v58 = vmul.f32 %v1045_v51, %v1018_v49 }
 0x487   :  { %v1019_v52 = vld [vmem:[#allocation5 + $0x8] sm:$0xff] }
 0x488   :  { %v1083_v50 = vmul.f32 %v1050_v41, %v1019_v52 }
 0x4e2   :  { %v1433_v45 = vpop.permute.xlu0 %1432 }
 0x4e3   :  { %v1435_v53 = vunpack.i.h.bf16 %v1433_v45  ;;  %v1434_v54 = vunpack.i.l.bf16 %v1433_v45 }
 0x4e5   :  { %v1114_v56 = vsel %vm208_vm1, %v1082_v58, %v1434_v54  ;;  %v1115_v35 = vsel %vm208_vm1, %v1083_v50, %v1435_v53 }
 0x4e6   :  { %v1438_v43 = vpop.permute.xlu1 %1437 }
 0x4e7   :  { %v1440_v57 = vunpack.i.h.bf16 %v1438_v43  ;;  %v1439_v34 = vunpack.i.l.bf16 %v1438_v43 }
 0x4e9   :  { %v1117_v28 = vsel %vm565_vm3, %v1115_v35, %v1440_v57  ;;  %v1116_v12 = vsel %vm565_vm3, %v1114_v56, %v1439_v34 }
 0x4ee   :  { %v1443_v11 = vpop.permute.xlu0 %1442 }
 0x4ef   :  { %v1445_v24 = vunpack.i.h.bf16 %v1443_v11  ;;  %v1444_v26 = vunpack.i.l.bf16 %v1443_v11 }
 0x4f1   :  { %v1119_v6 = vsel %vm1118_vm5, %v1116_v12, %v1444_v26  ;;  %v1120_v0 = vsel %vm1118_vm5, %v1117_v28, %v1445_v24 }
 0x4f2   :  { %v1121_v27 = vpack.c.bf16 %v1120_v0, %v1119_v6 }
 0x4f4   :  { %1413 = vmatmul.mubr.msk.bf16.vlgmr.msra.gmra.mxu0 %vm1145_vm6, %v1121_v27 }
 0x5b4   :  { %v1183_v31 = vpop.f32.mrf.mxu0 }
 0x5b5   :  { %v1184_v13 = vadd.f32 %v1277_v30, %v1183_v31 }
 0x5b6   :  { %v1414_v61 = vpop.f32.mrf.mxu0 }
 0x5b7   :  { %v1192_v10 = vadd.f32 %v1520_v14, %v1184_v13 }
 0x5b8   :  { %v1186_v17 = vpop.f32.mrf.mxu0 }
 0x5b9   :  { %v1187_v18 = vadd.f32 %v1277_v30, %v1186_v17  ;;  %1197 = vadd.xlane.f32.xlu1 %v1192_v10 }
 0x5ba   :  { %v1415_v19 = vpop.f32.mrf.mxu0 }
 0x5bb   :  { %v1193_v20 = vadd.f32 %v1521_v9, %v1187_v18 }
 0x5bd   :  { %1199 = vadd.xlane.f32.xlu0 %v1193_v20 }
 0x642   :  { %v1198_v25 = vpop.xlane.xlu1 %1197 }
 0x643   :  { %v1201_v15 = vmul.f32 0.03125, %v1198_v25 }
 0x645   :  { %v1203_v29 = vsub.f32 %v1192_v10, %v1201_v15 }
 0x646   :  { %v1200_v16 = vpop.xlane.xlu0 %1199 }
 0x647   :  { %v1202_v33 = vmul.f32 0.03125, %v1200_v16  ;;  %v1205_v38 = vsel %vm1196_vm7, %v1203_v29, 0.0 }
 0x648   :  { %v1207_v39 = vmul.f32 %v1205_v38, %v1205_v38 }
 0x649   :  { %v1204_v47 = vsub.f32 %v1193_v20, %v1202_v33 }
 0x64a   :  { %1209 = vadd.xlane.f32.xlu0 %v1207_v39 }
 0x64b   :  { %v1206_v21 = vsel %vm1196_vm7, %v1204_v47, 0.0 }
 0x64c   :  { %v1208_v48 = vmul.f32 %v1206_v21, %v1206_v21 }
 0x64e   :  { %1211 = vadd.xlane.f32.xlu1 %v1208_v48 }
 0x6d3   :  { %v1210_v55 = vpop.xlane.xlu0 %1209 }
 0x6d4   :  { %v1213_v59 = vmul.f32 0.03125, %v1210_v55 }
 0x6d6   :  { %v1215_v60 = vadd.f32 1e-05, %v1213_v59 }
 0x6d7   :  { %v1212_v62 = vpop.xlane.xlu1 %1211 }
 0x6d8   :  { %1516 = vrsqrt.f32 %v1215_v60  ;;  %v1214_v63 = vmul.f32 0.03125, %v1212_v62 }
 0x6da   :  { %v1216_v1 = vadd.f32 1e-05, %v1214_v63 }
 0x6dc   :  { %1518 = vrsqrt.f32 %v1216_v1 }
 0x6e5   :  { %v1517_v2 = vpop.eup %1516 }
 0x6e6   :  { %v1219_v3 = vmul.f32 %v1517_v2, %v1205_v38 }
 0x6e8   :  { %1221 = vst [vmem:[#allocation6] sm:$0xff] %v1219_v3 }
 0x6e9   :  { %v1519_v4 = vpop.eup %1518 }
 0x6ea   :  { %v1220_v5 = vmul.f32 %v1519_v4, %v1206_v21 }
 0x6ec   :  { %1222 = vst [vmem:[#allocation6 + $0x8] sm:$0xff] %v1220_v5 }
 0x6ed   :  { %1533 = shalt.err (!%p1530_p4)
}
 0x6ee   :  { %s1556_s17 = smov 128  }
 0x6ef   :  { %1234 = dma.vmem_to_hbm [thread:$0]  %s1229_s7, 256, %s2005_s8, [#allocation7], %s1556_s17, %s1556_s17, %s1552_s28  }
 0x6f0   :  { %1542 = dma.done.wait [#allocation7], 256  }
 0x6f1   :  { %1543 = vsyncadd [#allocation7], 4294967040 }
 0x6f2   :  { %1238 = vsyncpa [#allocation7], 1 }

</bundles_post_ra>
